<compile_context>
chip_gen: v5e
topology: v5e:2x2
jax: 0.10.0
libtpu: 0.0.40
codegen_flags: <defaults>
</compile_context>

<pallas_src>
import numpy as np
import jax
import jax.numpy as jnp
from jax.experimental import pallas as pl
from jax.experimental.pallas import tpu as pltpu


def _build_pe(d_model: int, max_len: int = 5000, dtype=jnp.float32) -> jnp.ndarray:
    """Deterministic sinusoidal table, shape (1, max_len, d_model), stored in `dtype`."""
    position = np.arange(0, max_len, dtype=np.float32)[:, None]             # (max_len, 1)
    div_term = np.exp(np.arange(0, d_model, 2, dtype=np.float32)
                      * (-np.log(10000.0) / d_model))                       # (ceil(d/2),)
    pe = np.zeros((max_len, d_model), dtype=np.float32)
    pe[:, 0::2] = np.sin(position * div_term)
    pe[:, 1::2] = np.cos(position * div_term[: d_model // 2])
    return jnp.asarray(pe, dtype=dtype)[None, :, :]                         # (1, max_len, d_model)


def _add_pe_kernel(x_ref, pe_ref, o_ref):
    # x_ref / pe_ref / o_ref: 2D (tile_rows, lane_dim) tiles (batch dim squeezed away).
    o_ref[...] = x_ref[...] + pe_ref[...]


_TARGET_BLOCK_BYTES = 4 * 1024 * 1024      # 3 arrays x 2 buffers = 24 MiB live VMEM
_TINY_FALLBACK_BYTES = 256 * 1024          # below this, plain XLA add wins

_COMPILER_PARAMS = pltpu.CompilerParams(
    dimension_semantics=("parallel", "arbitrary"),   # seq tiles sharded; batch inner/serial
    vmem_limit_bytes=32 * 1024 * 1024,               # required on v5e (16 MiB scoped default)
)


def _sublane_multiple(itemsize: int) -> int:
    # f32 -> 8, bf16 -> 16, int8/fp8 -> 32 (sub-32-bit dtypes pack along sublanes).
    return max(8, 32 // itemsize)


def _choose_tile_rows(n_rows: int, row_bytes: int, sub_mult: int) -> int:
    """Largest sublane-aligned row count with tile <= target bytes.

    If one tile would cover everything, split in two so the outer (parallel)
    grid axis has >= 2 steps for v7x's dual TensorCores.
    """
    rows = _TARGET_BLOCK_BYTES // max(row_bytes, 1)
    rows -= rows % sub_mult
    rows = max(rows, sub_mult)
    if rows >= n_rows:
        if n_rows >= 2 * sub_mult:
            half = -(-n_rows // 2)                        # ceil(n_rows / 2)
            half = -(-half // sub_mult) * sub_mult        # round up to sublane multiple
            return min(half, n_rows)
        return n_rows                                     # full-extent block (always legal)
    return rows


def positional_encoding_forward(x: jnp.ndarray, pe: jnp.ndarray) -> jnp.ndarray:
    """x: (B, S, D); pe: (1, max_len, D). Returns x + pe[:, :S, :]."""
    B, S, D = x.shape
    itemsize = jnp.dtype(x.dtype).itemsize

    # Tiny inputs: Pallas call/per-step overhead dominates; let XLA fuse the add.
    if B * S * D * itemsize < _TINY_FALLBACK_BYTES:
        return x + pe[:, :S, :].astype(x.dtype)

    needs_cast = pe.dtype != x.dtype
    sub_mult = _sublane_multiple(itemsize)

    lane_dense_fold = (D % 128 != 0) and ((S * D) % 128 == 0)
    # TODO(synk): could also fold across batch when only (B*S*D) % 128 == 0, but that
    # breaks the simple per-batch pe tile mapping; such shapes stay on Layout A.

    if not lane_dense_fold:
        # ---- Layout A: (B, S, D); tile along S, lane dim = full D. ----
        ts = _choose_tile_rows(S, D * itemsize, sub_mult)
        if needs_cast or ts == S:
            # Cast/slice only the S rows actually used (ts == S also needs the slice so
            # the pe block equals the full array dims when S isn't sublane-aligned).
            pe_in = pe[0, :S, :].astype(x.dtype)          # (S, D), small
        else:
            pe_in = pe[0]                                 # (max_len, D), zero-copy view
        grid = (pl.cdiv(S, ts), B)

        return pl.pallas_call(
            _add_pe_kernel,
            out_shape=jax.ShapeDtypeStruct((B, S, D), x.dtype),
            grid_spec=pltpu.PrefetchScalarGridSpec(
                num_scalar_prefetch=0,
                grid=grid,
                in_specs=[
                    pl.BlockSpec((pl.Squeezed(), ts, D), lambda s, b: (b, s, 0)),
                    # pe block index is independent of the inner batch axis -> no re-DMA
                    # across consecutive grid steps.
                    pl.BlockSpec((ts, D), lambda s, b: (s, 0)),
                ],
                out_specs=pl.BlockSpec((pl.Squeezed(), ts, D), lambda s, b: (b, s, 0)),
            ),
            compiler_params=_COMPILER_PARAMS,
        )(x, pe_in)

    # ---- Layout B: D not 128-aligned but S*D is -> fold per-batch to lane-dense (rows, 128). ----
    lanes = 128
    rows = (S * D) // lanes
    x_flat = x.reshape(B, rows, lanes)                    # trailing-dim merge: no copy
    pe_flat = pe[0, :S, :].astype(x.dtype).reshape(rows, lanes)   # small (S*D) slice
    tr = _choose_tile_rows(rows, lanes * itemsize, sub_mult)
    grid = (pl.cdiv(rows, tr), B)

    out = pl.pallas_call(
        _add_pe_kernel,
        out_shape=jax.ShapeDtypeStruct((B, rows, lanes), x.dtype),
        grid_spec=pltpu.PrefetchScalarGridSpec(
            num_scalar_prefetch=0,
            grid=grid,
            in_specs=[
                pl.BlockSpec((pl.Squeezed(), tr, lanes), lambda r, b: (b, r, 0)),
                pl.BlockSpec((tr, lanes), lambda r, b: (r, 0)),
            ],
            out_specs=pl.BlockSpec((pl.Squeezed(), tr, lanes), lambda r, b: (b, r, 0)),
        ),
        compiler_params=_COMPILER_PARAMS,
    )(x_flat, pe_flat)
    return out.reshape(B, S, D)


if __name__ == "__main__":
    key = jax.random.PRNGKey(0)
    max_len = 5000

    # 1) Toy shape implied by the module (hits the tiny-input plain-JAX fast path).
    b1, s1, d1 = 2, 8, 32
    pe1 = _build_pe(d1, max_len)
    x1 = jax.random.normal(key, (b1, s1, d1), dtype=jnp.float32)
    out1 = jax.block_until_ready(positional_encoding_forward(x1, pe1))
    np.testing.assert_allclose(np.asarray(out1), np.asarray(x1 + pe1[:, :s1, :]),
                               rtol=1e-6, atol=1e-6)

    # 2) Layout A Pallas path: D is 128-aligned.
    b2, s2, d2 = 2, 512, 128
    pe2 = _build_pe(d2, max_len)
    x2 = jax.random.normal(jax.random.fold_in(key, 2), (b2, s2, d2), dtype=jnp.float32)
    out2 = jax.block_until_ready(positional_encoding_forward(x2, pe2))
    np.testing.assert_allclose(np.asarray(out2), np.asarray(x2 + pe2[:, :s2, :]),
                               rtol=1e-6, atol=1e-6)

    # 3) Layout B Pallas path: D=32 (not 128-aligned), S*D % 128 == 0 -> lane-dense fold.
    b3, s3, d3 = 2, 2048, 32
    pe3 = _build_pe(d3, max_len)
    x3 = jax.random.normal(jax.random.fold_in(key, 3), (b3, s3, d3), dtype=jnp.float32)
    out3 = jax.block_until_ready(positional_encoding_forward(x3, pe3))
    np.testing.assert_allclose(np.asarray(out3), np.asarray(x3 + pe3[:, :s3, :]),
                               rtol=1e-6, atol=1e-6)

    # 4) bf16 activation path: table stored in bf16 at init (no per-call full-table cast),
    #    exercises the dtype-aware (16-row) sublane rounding.
    pe4 = _build_pe(d2, max_len, dtype=jnp.bfloat16)
    x4 = x2.astype(jnp.bfloat16)
    out4 = jax.block_until_ready(positional_encoding_forward(x4, pe4))
    ref4 = (x4 + pe4[:, :s2, :]).astype(jnp.float32)
    np.testing.assert_allclose(np.asarray(out4).astype(np.float32), np.asarray(ref4),
                               rtol=1e-2, atol=1e-2)

    print("KERNEL_OK")
</pallas_src>

<mosaic_0001>
module attributes {stable_mosaic.version = 11 : i64} {
  func.func @_add_pe_kernel(%arg0: i32, %arg1: i32, %arg2: memref<1x256x128xf32, #tpu.memory_space<vmem>>, %arg3: memref<256x128xf32, #tpu.memory_space<vmem>>, %arg4: memref<1x256x128xf32, #tpu.memory_space<vmem>>) attributes {dimension_semantics = [#tpu.dimension_semantics<parallel>, #tpu.dimension_semantics<arbitrary>], iteration_bounds = array<i64: 2, 2>, scalar_prefetch = 0 : i64, scratch_operands = 0 : i64, tpu.core_type = #tpu.core_type<tc>, window_params = [{transform_indices = @transform_0, window_bounds = array<i64: 1, 256, 128>}, {transform_indices = @transform_1, window_bounds = array<i64: 256, 128>}, {transform_indices = @transform_2, window_bounds = array<i64: 1, 256, 128>}]} {
    %c0 = arith.constant 0 : index
    %c0_0 = arith.constant 0 : index
    %c0_1 = arith.constant 0 : index
    %0 = vector.load %arg2[%c0, %c0_0, %c0_1] : memref<1x256x128xf32, #tpu.memory_space<vmem>>, vector<1x256x128xf32>
    %1 = vector.shape_cast %0 : vector<1x256x128xf32> to vector<256x128xf32>
    %c0_2 = arith.constant 0 : index
    %c0_3 = arith.constant 0 : index
    %2 = vector.load %arg3[%c0_2, %c0_3] : memref<256x128xf32, #tpu.memory_space<vmem>>, vector<256x128xf32>
    %3 = arith.addf %1, %2 : vector<256x128xf32>
    %c0_4 = arith.constant 0 : index
    %c0_5 = arith.constant 0 : index
    %c0_6 = arith.constant 0 : index
    %4 = vector.load %arg4[%c0_4, %c0_5, %c0_6] : memref<1x256x128xf32, #tpu.memory_space<vmem>>, vector<1x256x128xf32>
    %5 = vector.shape_cast %4 : vector<1x256x128xf32> to vector<256x128xf32>
    %6 = vector.shape_cast %3 : vector<256x128xf32> to vector<1x256x128xf32>
    tpu.vector_store %arg4[%c0_4, %c0_5, %c0_6], %6 {strides = array<i32>} : memref<1x256x128xf32, #tpu.memory_space<vmem>>, vector<1x256x128xf32>,
    return
  }
  func.func @transform_0(%arg0: i32, %arg1: i32) -> (i32, i32, i32) {
    %c0_i32 = arith.constant 0 : i32
    %c0_i32_0 = arith.constant 0 : i32
    return %arg1, %arg0, %c0_i32 : i32, i32, i32
  }
  func.func @transform_1(%arg0: i32, %arg1: i32) -> (i32, i32) {
    %c0_i32 = arith.constant 0 : i32
    %c0_i32_0 = arith.constant 0 : i32
    return %arg0, %c0_i32 : i32, i32
  }
  func.func @transform_2(%arg0: i32, %arg1: i32) -> (i32, i32, i32) {
    %c0_i32 = arith.constant 0 : i32
    %c0_i32_0 = arith.constant 0 : i32
    return %arg1, %arg0, %c0_i32 : i32, i32, i32
  }
}

</mosaic_0001>

<bundles_post_ra>
// kernel: tpu_custom_call.1
= control target key start
LH: loop header
LB: loop body
LE: loop exit
PB: predicated region body
PF: predicated region fallthrough
CT: control target
= control target key end

     0   :  { %7 = vsyncpa [#allocation3], 0  ;;  %s1173_s0 = inlined_call_operand.hbm [shape: f32[2,512,128], index: 0, kind: input, shape index: {}]   ;;  %s1174_s1 = inlined_call_operand.hbm [shape: f32[5000,128], index: 1, kind: input, shape index: {}]   ;;  %s1175_s2 = inlined_call_operand.hbm [shape: f32[2,512,128], index: 2, kind: output, shape index: {}]  }
   0x1   :  { %9 = vsyncpa [#allocation3 + $0x1], 0 }
   0x2   :  { %10 = vsyncpa [#allocation6], 0 }
   0x3   :  { %12 = vsyncpa [#allocation6 + $0x1], 0 }
   0x4   :  { %13 = vsyncpa [#allocation4], 0 }
   0x5   :  { %15 = vsyncpa [#allocation4 + $0x1], 0  ;;  %s846_s9 = smov 0   ;;  %s848_s10 = smov 0  }
   0x6   :  { %s850_s11 = smov 0   ;;  %s852_s12 = smov 0  }
   0x7   :  { %s854_s13 = smov 0   ;;  %s856_s14 = smov 0  }
   0x8   :  { %s858_s15 = smov 0   ;;  %s860_s16 = smov 0  }
   0x9   :  { %s862_s17 = smov 0   ;;  %s864_s18 = smov 0  }
   0xa   :  { %s866_s19 = smov 0  }
   0xb LB: > { %1183 = sst [smem:[#allocation11_spill]] %s794_s12  ;;  %s497_s20 = sadd.s32 4294967295, %s822_s19   ;;  %s822_s19 = sphi %s866_s19, %s21_s19   ;;  %s818_s18 = sphi %s864_s18, %s1214_s18   ;;  %s814_s17 = sphi %s862_s17, %s1213_s17   ;;  %s810_s16 = sphi %s860_s16, %s1212_s16   ;;  %s806_s15 = sphi %s858_s15, %s1211_s15   ;;  %s802_s14 = sphi %s856_s14, %s1210_s14   ;;  %s798_s13 = sphi %s854_s13, %s1209_s13   ;;  %s794_s12 = sphi %s852_s12, %s1208_s12   ;;  %s790_s11 = sphi %s850_s11, %s1207_s11   ;;  %s786_s10 = sphi %s848_s10, %s1206_s10   ;;  %s782_s9 = sphi %s846_s9, %s1205_s9  }
   0xc   : > { %s498_s21 = sadd.s32 4294967294, %s822_s19   ;;  %s30_s22 = sadd.s32 1, %s814_s17 }
   0xd   : > { %s33_s23 = sadd.s32 1, %s818_s18  ;;  %p31_p0 = scmp.ge.s32.totalorder %s30_s22, 2 }
   0xe   : > { %s42_s24 = sadd.s32 1, %s802_s14  ;;  %p49_p1 = scmp.ne.s32.totalorder %s802_s14, %s798_s13 }
   0xf   : > { %p50_p2 = scmp.eq.s32.totalorder %s822_s19, 0  ;;  %s1216_s22 = smov (%p31_p0, %s30_s22), 0 }
  0x10   : > { %1184 = sst [smem:[#allocation12_spill]] %s1216_s22  ;;  %s1218_s23 = smov (!%p31_p0, %s33_s23), %s818_s18 }
  0x11   : > { %s37_s25 = ssub.s32 %s814_s17, %s1216_s22  ;;  %p919_p3 = por %p50_p2, %p49_p1 }
  0x12   : > { %p35_p4 = scmp.ge.s32.totalorder %s1218_s23, 2  ;;  %p1176_p5 = scmp.ne.s32.totalorder %s798_s13, %s794_s12 }
  0x13   : > { %p925_p6 = scmp.eq.s32.totalorder %s497_s20, 0  ;;  %s68_s28 = sadd.s32 1, %s790_s11 }
  0x14   : > { %s1220_s23 = smov (%p35_p4, %s1218_s23), 0  ;;  %p75_p8 = scmp.ne.s32.totalorder %s790_s11, %s786_s10 }
  0x15   : > { %1187 = sst [smem:[#allocation13_spill]] %s1220_s23  ;;  %p937_p7 = por %p925_p6, %p1176_p5 }
  0x16   : > { %s38_s30 = ssub.s32 %s818_s18, %s1220_s23  ;;  %p81_p9 = scmp.ne.s32.totalorder %s786_s10, %s782_s9 }
  0x17   : > { %s39_s3 = sor.u32 %s38_s30, %s37_s25  ;;  %p66_p10 = scmp.eq.s32.totalorder %s38_s30, 0 }
  0x18   : > { %p40_p11 = scmp.eq.s32.totalorder %s39_s3, 0  ;;  %p949_p12 = por %p75_p8, %p50_p2 }
  0x19   : > { %s954_s5 = scalar_select %p66_p10, %s790_s11, %s68_s28  }
  0x1a   : > { %s957_s6 = scalar_select %p40_p11, %s802_s14, %s42_s24  }
  0x1b   : > { %1190 = sst [smem:[#allocation14_spill]] %s954_s5  ;;  %p961_p13 = por %p81_p9, %p925_p6 }
  0x1c   : > { %1191 = sst [smem:[#allocation15_spill]] %s957_s6  ;;  %p107_p0 = scmp.eq.s32.totalorder %s497_s20, 3 }
  0x1d   : > { %p113_p4 = scmp.eq.s32.totalorder %s498_s21, 3  ;;  %p1195_p2 = scmp.ne.s32.totalorder %s798_s13, %s794_s12 }
  0x1e   : > { %p968_p5 = por %p107_p0, %p49_p1  ;;  %p500_p10 = scmp.ge.s32.totalorder %s822_s19, 4 }
  0x1f   : > { %p975_p8 = por %p113_p4, %p1195_p2  ;;  %s133_s24 = sand.u32 (!%p500_p10), 1, %s802_s14  }
  0x20   : > { %s1193_s8 = scalar_select %p968_p5, 1, 0 }
  0x21   : > { %s1196_s9 = scalar_select %p975_p8, 1, 0 }
  0x22   : > { %1194 = sst [smem:[#allocation16_spill]] %s1193_s8  ;;  %129 = sbr.rel (%p500_p10) target bundleno = 63 (0x3f), region = 16 }
  0x23   : > { %1197 = sst [smem:[#allocation17_spill]] %s1196_s9  ;;  %s502_s20 = sshll.u32 (!%p500_p10), %s818_s18, 5 }
  0x24   : > { %s501_s21 = sshll.u32 (!%p500_p10), %s133_s24, 8  ;;  %s503_s25 = sshll.u32 (!%p500_p10), %s814_s17, 6 }
  0x25   : > { %s142_s27 = sadd.s32 (!%p500_p10), %s503_s25, %s502_s20  ;;  %s137_s28 = scalar_lea.vmem (!%p500_p10), [#allocation2], %s501_s21 }
  0x26   : > { %s147_s30 = sshll.u32 (!%p500_p10), %s137_s28, 4  ;;  %s504_s3 = sshll.u32 (!%p500_p10), %s142_s27, 3  ;;  %s148_s30 = int_to_ptr.vmem [resolvable:$true] %s147_s30 }
  0x27   : > { %s144_s6 = scalar_lea.hbm %s1173_s0, %s504_s3  ;;  %s134_s9 = scalar_lea.sflag [#allocation3], %s133_s24 }
  0x28   : > { %s145_s5 = sshll.u32 %s144_s6, 4  ;;  %s824_s12 = smov 128   ;;  %s146_s5 = int_to_ptr.hbm [resolvable:$true] %s145_s5 }
  0x29   : > { %s825_s8 = smov 8   ;;  %156 = sbr.rel (!%p949_p12) target bundleno = 63 (0x3f), region = 24 }
  0x2a   : > { %523 = dma.hbm_to_vmem [thread:$0]  (%p919_p3), %s146_s5, 4096, %s148_s30, %s134_s9, %s824_s12, %s824_s12, %s825_s8  }
  0x2b   : > { %s157_s20 = sand.u32 (%p949_p12), 1, %s790_s11   ;;  %s522_s28 = sshll.u32 (%p949_p12), %s818_s18, 8 }
  0x2c   : > { %s505_s21 = sshll.u32 (%p949_p12), %s157_s20, 8  ;;  %s991_s25 = scalar_lea.sflag (%p949_p12), [#allocation6], %s157_s20 }
  0x2d   : > { %s161_s27 = scalar_lea.vmem (%p949_p12), [#allocation5], %s505_s21  ;;  %s172_s6 = scalar_lea.hbm (%p949_p12), %s1174_s1, %s522_s28 }
  0x2e   : > { %s176_s24 = sshll.u32 %s161_s27, 4  ;;  %s174_s3 = sshll.u32 %s172_s6, 4  ;;  %s177_s24 = int_to_ptr.vmem [resolvable:$true] %s176_s24  ;;  %s175_s3 = int_to_ptr.hbm [resolvable:$true] %s174_s3 }
  0x2f   : > { %s655_s12 = sshra.s32 %s175_s3, 4  ;;  %s666_s8 = scalar_lea.hbm %s1174_s1, 5000  ;;  %s656_s12 = int_to_ptr.hbm [resolvable:$true] %s655_s12 }
  0x30   : > { %s662_s26 = scalar_lea.hbm %s656_s12, 256 }
  0x31   : > { %p663_p1 = scmp.ne.s32.totalorder %s656_s12, %s662_s26  ;;  %p668_p3 = scmp.lt.s32.totalorder %s666_s8, %s662_s26 }
  0x33   : > { %p670_p6 = pnand %p668_p3, %p663_p1 }
  0x35   : > { %673 = shalt.err (!%p670_p6)
}
  0x36   : > { %s674_s9 = sshra.s32 %s177_s24, 4  ;;  %s826_s20 = smov [#allocation5]   ;;  %s675_s9 = int_to_ptr.vmem [resolvable:$true] %s674_s9 }
  0x37   : > { %s681_s30 = scalar_lea.vmem %s675_s9, 256  ;;  %s685_s21 = scalar_lea.vmem %s826_s20, 512 }
  0x38   : > { %p682_p9 = scmp.ne.s32.totalorder %s675_s9, %s681_s30  ;;  %p687_p11 = scmp.lt.s32.totalorder %s685_s21, %s681_s30 }
  0x3a   : > { %p689_p12 = pnand %p687_p11, %p682_p9 }
  0x3c   : > { %692 = shalt.err (!%p689_p12)
}
  0x3d   : > { %s827_s27 = smov 128   ;;  %s828_s28 = smov 8  }
  0x3e   : > { %182 = dma.hbm_to_vmem [thread:$0]  %s175_s3, 4096, %s177_s24, %s991_s25, %s827_s27, %s827_s27, %s828_s28  }
  0x3f PF: > { %p512_p0 = scmp.ge.s32.totalorder %s822_s19, 1  ;;  %p184_p4 = scmp.lt.s32.totalorder %s822_s19, 5 }
  0x41   : > { %p185_p2 = pnand %p512_p0, %p184_p4 }
  0x42   : > { %s1004_s22 = sand.u32 (!%p185_p2), 1, %s798_s13  }
  0x43   : > { %188 = sbr.rel (%p185_p2) target bundleno = 116 (0x74), region = 28  ;;  %s513_s23 = sshll.u32 (!%p185_p2), %s1004_s22, 8 }
  0x44   : > { %s191_s6 = scalar_lea.sflag (!%p185_p2), [#allocation3], %s1004_s22  ;;  %s1008_s12 = scalar_lea.vmem (!%p185_p2), [#allocation2], %s513_s23 }
  0x48   : > { %767 = dma.done.wait (%p937_p7), %s191_s6, 4096  }
  0x49   : > { %769 = vsyncadd (%p937_p7), %s191_s6, 4294963200  ;;  %s200_s25 = sand.u32 1, %s786_s10  }
  0x4a   : > { %s514_s24 = sshll.u32 %s200_s25, 8  ;;  %s201_s3 = scalar_lea.sflag [#allocation6], %s200_s25 }
  0x4b   : > { %s1015_s26 = scalar_lea.vmem [#allocation5], %s514_s24 }
  0x4c   : > { %771 = dma.done.wait (%p961_p13), %s201_s3, 4096  }
  0x4d   : > { %773 = vsyncadd (%p961_p13), %s201_s3, 4294963200  ;;  %v238_v0 = vld [vmem:[%s1008_s12] sm:$0xff]  ;;  %v239_v2 = vld [vmem:[%s1008_s12 + $0x8] sm:$0xff]  ;;  %s1030_s29 = scalar_lea.vmem [#allocation7], %s513_s23  ;;  %s517_s7 = sshll.u32 %s810_s16, 5 }
  0x4e   : > { %v270_v1 = vld [vmem:[%s1015_s26] sm:$0xff]  ;;  %v271_v4 = vld [vmem:[%s1015_s26 + $0x8] sm:$0xff]  ;;  %v240_v5 = vld [vmem:[%s1008_s12 + $0x10] sm:$0xff]  ;;  %s518_s4 = sshll.u32 %s806_s15, 6  ;;  %s381_s30 = sshll.u32 %s1030_s29, 4  ;;  %s382_s30 = int_to_ptr.vmem [resolvable:$true] %s381_s30 }
  0x4f   : > { %v302_v3 = vadd.f32 %v270_v1, %v238_v0  ;;  %v272_v6 = vld [vmem:[%s1015_s26 + $0x10] sm:$0xff]  ;;  %v303_v7 = vadd.f32 %v271_v4, %v239_v2  ;;  %v241_v9 = vld [vmem:[%s1008_s12 + $0x18] sm:$0xff]  ;;  %v242_v11 = vld [vmem:[%s1008_s12 + $0x20] sm:$0xff]  ;;  %s378_s15 = sadd.s32 %s518_s4, %s517_s7  ;;  %s367_s27 = scalar_lea.sflag [#allocation4], %s1004_s22 }
  0x50   : > { %v304_v8 = vadd.f32 %v272_v6, %v240_v5  ;;  %v273_v10 = vld [vmem:[%s1015_s26 + $0x18] sm:$0xff]  ;;  %v274_v13 = vld [vmem:[%s1015_s26 + $0x20] sm:$0xff]  ;;  %v243_v14 = vld [vmem:[%s1008_s12 + $0x28] sm:$0xff]  ;;  %s519_s16 = sshll.u32 %s378_s15, 3  ;;  %s714_s25 = scalar_lea.hbm %s1175_s2, 1024 }
  0x51   : > { %334 = vst [vmem:[%s1030_s29] sm:$0xff] %v302_v3  ;;  %v305_v12 = vadd.f32 %v273_v10, %v241_v9  ;;  %v275_v15 = vld [vmem:[%s1015_s26 + $0x28] sm:$0xff]  ;;  %v306_v16 = vadd.f32 %v274_v13, %v242_v11  ;;  %v244_v18 = vld [vmem:[%s1008_s12 + $0x30] sm:$0xff]  ;;  %v245_v20 = vld [vmem:[%s1008_s12 + $0x38] sm:$0xff]  ;;  %s380_s9 = scalar_lea.hbm %s1175_s2, %s519_s16 }
  0x52   : > { %335 = vst [vmem:[%s1030_s29 + $0x8] sm:$0xff] %v303_v7  ;;  %v307_v17 = vadd.f32 %v275_v15, %v243_v14  ;;  %v276_v19 = vld [vmem:[%s1015_s26 + $0x30] sm:$0xff]  ;;  %v277_v22 = vld [vmem:[%s1015_s26 + $0x38] sm:$0xff]  ;;  %v246_v23 = vld [vmem:[%s1008_s12 + $0x40] sm:$0xff]  ;;  %s383_s21 = sshll.u32 %s380_s9, 4  ;;  %s384_s21 = int_to_ptr.hbm [resolvable:$true] %s383_s21 }
  0x53   : > { %336 = vst [vmem:[%s1030_s29 + $0x10] sm:$0xff] %v304_v8  ;;  %v308_v21 = vadd.f32 %v276_v19, %v244_v18  ;;  %v278_v24 = vld [vmem:[%s1015_s26 + $0x40] sm:$0xff]  ;;  %v309_v25 = vadd.f32 %v277_v22, %v245_v20  ;;  %v247_v26 = vld [vmem:[%s1008_s12 + $0x48] sm:$0xff]  ;;  %v248_v28 = vld [vmem:[%s1008_s12 + $0x50] sm:$0xff]  ;;  %s708_s28 = sshra.s32 %s384_s21, 4  ;;  %s709_s28 = int_to_ptr.hbm [resolvable:$true] %s708_s28 }
  0x54   : > { %337 = vst [vmem:[%s1030_s29 + $0x18] sm:$0xff] %v305_v12  ;;  %v279_v27 = vld [vmem:[%s1015_s26 + $0x48] sm:$0xff]  ;;  %v310_v29 = vadd.f32 %v278_v24, %v246_v23  ;;  %v280_v30 = vld [vmem:[%s1015_s26 + $0x50] sm:$0xff]  ;;  %v249_v31 = vld [vmem:[%s1008_s12 + $0x58] sm:$0xff]  ;;  %s710_s23 = scalar_lea.hbm %s709_s28, 256  ;;  %p715_p1 = scmp.lt.s32.totalorder %s709_s28, %s1175_s2 }
  0x55   : > { %338 = vst [vmem:[%s1030_s29 + $0x20] sm:$0xff] %v306_v16  ;;  %v281_v32 = vld [vmem:[%s1015_s26 + $0x58] sm:$0xff]  ;;  %v311_v33 = vadd.f32 %v279_v27, %v247_v26  ;;  %v250_v34 = vld [vmem:[%s1008_s12 + $0x60] sm:$0xff]  ;;  %v312_v36 = vadd.f32 %v280_v30, %v248_v28  ;;  %v251_v37 = vld [vmem:[%s1008_s12 + $0x68] sm:$0xff]  ;;  %p711_p7 = scmp.ne.s32.totalorder %s709_s28, %s710_s23  ;;  %p716_p3 = scmp.lt.s32.totalorder %s714_s25, %s710_s23 }
  0x56   : > { %339 = vst [vmem:[%s1030_s29 + $0x28] sm:$0xff] %v307_v17  ;;  %v282_v35 = vld [vmem:[%s1015_s26 + $0x60] sm:$0xff]  ;;  %v283_v38 = vld [vmem:[%s1015_s26 + $0x68] sm:$0xff]  ;;  %v313_v39 = vadd.f32 %v281_v32, %v249_v31  ;;  %v252_v40 = vld [vmem:[%s1008_s12 + $0x70] sm:$0xff] }
  0x57   : > { %340 = vst [vmem:[%s1030_s29 + $0x30] sm:$0xff] %v308_v21  ;;  %v284_v41 = vld [vmem:[%s1015_s26 + $0x70] sm:$0xff]  ;;  %v314_v42 = vadd.f32 %v282_v35, %v250_v34  ;;  %v253_v43 = vld [vmem:[%s1008_s12 + $0x78] sm:$0xff]  ;;  %v315_v45 = vadd.f32 %v283_v38, %v251_v37  ;;  %v254_v46 = vld [vmem:[%s1008_s12 + $0x80] sm:$0xff]  ;;  %p712_p13 = pnand %p711_p7, %p968_p5  ;;  %p717_p6 = por %p716_p3, %p715_p1 }
  0x58   : > { %341 = vst [vmem:[%s1030_s29 + $0x38] sm:$0xff] %v309_v25  ;;  %v285_v44 = vld [vmem:[%s1015_s26 + $0x78] sm:$0xff]  ;;  %v286_v47 = vld [vmem:[%s1015_s26 + $0x80] sm:$0xff]  ;;  %v316_v48 = vadd.f32 %v284_v41, %v252_v40  ;;  %v255_v49 = vld [vmem:[%s1008_s12 + $0x88] sm:$0xff] }
  0x59   : > { %342 = vst [vmem:[%s1030_s29 + $0x40] sm:$0xff] %v310_v29  ;;  %v287_v50 = vld [vmem:[%s1015_s26 + $0x88] sm:$0xff]  ;;  %v317_v51 = vadd.f32 %v285_v44, %v253_v43  ;;  %v256_v52 = vld [vmem:[%s1008_s12 + $0x90] sm:$0xff]  ;;  %v318_v54 = vadd.f32 %v286_v47, %v254_v46  ;;  %v257_v55 = vld [vmem:[%s1008_s12 + $0x98] sm:$0xff]  ;;  %p713_p10 = pneg %p712_p13 }
  0x5a   : > { %343 = vst [vmem:[%s1030_s29 + $0x48] sm:$0xff] %v311_v33  ;;  %v288_v53 = vld [vmem:[%s1015_s26 + $0x90] sm:$0xff]  ;;  %v289_v56 = vld [vmem:[%s1015_s26 + $0x98] sm:$0xff]  ;;  %v319_v57 = vadd.f32 %v287_v50, %v255_v49  ;;  %v258_v58 = vld [vmem:[%s1008_s12 + $0xa0] sm:$0xff] }
  0x5b   : > { %344 = vst [vmem:[%s1030_s29 + $0x50] sm:$0xff] %v312_v36  ;;  %v290_v59 = vld [vmem:[%s1015_s26 + $0xa0] sm:$0xff]  ;;  %v320_v60 = vadd.f32 %v288_v53, %v256_v52  ;;  %v259_v61 = vld [vmem:[%s1008_s12 + $0xa8] sm:$0xff]  ;;  %v321_v63 = vadd.f32 %v289_v56, %v257_v55  ;;  %v260_v0 = vld [vmem:[%s1008_s12 + $0xb0] sm:$0xff]  ;;  %p718_p9 = pnand %p717_p6, %p713_p10 }
  0x5c   : > { %345 = vst [vmem:[%s1030_s29 + $0x58] sm:$0xff] %v313_v39  ;;  %v291_v62 = vld [vmem:[%s1015_s26 + $0xa8] sm:$0xff]  ;;  %v292_v1 = vld [vmem:[%s1015_s26 + $0xb0] sm:$0xff]  ;;  %v322_v2 = vadd.f32 %v290_v59, %v258_v58  ;;  %v261_v3 = vld [vmem:[%s1008_s12 + $0xb8] sm:$0xff] }
  0x5d   : > { %346 = vst [vmem:[%s1030_s29 + $0x60] sm:$0xff] %v314_v42  ;;  %v293_v4 = vld [vmem:[%s1015_s26 + $0xb8] sm:$0xff]  ;;  %v323_v5 = vadd.f32 %v291_v62, %v259_v61  ;;  %v262_v6 = vld [vmem:[%s1008_s12 + $0xc0] sm:$0xff]  ;;  %v324_v8 = vadd.f32 %v292_v1, %v260_v0  ;;  %v263_v9 = vld [vmem:[%s1008_s12 + $0xc8] sm:$0xff] }
  0x5e   : > { %347 = vst [vmem:[%s1030_s29 + $0x68] sm:$0xff] %v315_v45  ;;  %v294_v7 = vld [vmem:[%s1015_s26 + $0xc0] sm:$0xff]  ;;  %v295_v10 = vld [vmem:[%s1015_s26 + $0xc8] sm:$0xff]  ;;  %v325_v11 = vadd.f32 %v293_v4, %v261_v3  ;;  %v264_v12 = vld [vmem:[%s1008_s12 + $0xd0] sm:$0xff] }
  0x5f   : > { %348 = vst [vmem:[%s1030_s29 + $0x70] sm:$0xff] %v316_v48  ;;  %v296_v13 = vld [vmem:[%s1015_s26 + $0xd0] sm:$0xff]  ;;  %v326_v14 = vadd.f32 %v294_v7, %v262_v6  ;;  %v265_v15 = vld [vmem:[%s1008_s12 + $0xd8] sm:$0xff]  ;;  %v327_v17 = vadd.f32 %v295_v10, %v263_v9  ;;  %v266_v18 = vld [vmem:[%s1008_s12 + $0xe0] sm:$0xff] }
  0x60   : > { %349 = vst [vmem:[%s1030_s29 + $0x78] sm:$0xff] %v317_v51  ;;  %v297_v16 = vld [vmem:[%s1015_s26 + $0xd8] sm:$0xff]  ;;  %v298_v19 = vld [vmem:[%s1015_s26 + $0xe0] sm:$0xff]  ;;  %v328_v20 = vadd.f32 %v296_v13, %v264_v12  ;;  %v267_v21 = vld [vmem:[%s1008_s12 + $0xe8] sm:$0xff] }
  0x61   : > { %350 = vst [vmem:[%s1030_s29 + $0x80] sm:$0xff] %v318_v54  ;;  %v299_v22 = vld [vmem:[%s1015_s26 + $0xe8] sm:$0xff]  ;;  %v329_v23 = vadd.f32 %v297_v16, %v265_v15  ;;  %v268_v24 = vld [vmem:[%s1008_s12 + $0xf0] sm:$0xff]  ;;  %v330_v26 = vadd.f32 %v298_v19, %v266_v18  ;;  %v269_v27 = vld [vmem:[%s1008_s12 + $0xf8] sm:$0xff] }
  0x62   : > { %351 = vst [vmem:[%s1030_s29 + $0x88] sm:$0xff] %v319_v57  ;;  %v300_v25 = vld [vmem:[%s1015_s26 + $0xf0] sm:$0xff]  ;;  %v301_v28 = vld [vmem:[%s1015_s26 + $0xf8] sm:$0xff]  ;;  %v331_v29 = vadd.f32 %v299_v22, %v267_v21 }
  0x63   : > { %352 = vst [vmem:[%s1030_s29 + $0x90] sm:$0xff] %v320_v60  ;;  %v332_v30 = vadd.f32 %v300_v25, %v268_v24  ;;  %v333_v31 = vadd.f32 %v301_v28, %v269_v27 }
  0x64   : > { %353 = vst [vmem:[%s1030_s29 + $0x98] sm:$0xff] %v321_v63 }
  0x65   : > { %354 = vst [vmem:[%s1030_s29 + $0xa0] sm:$0xff] %v322_v2 }
  0x66   : > { %355 = vst [vmem:[%s1030_s29 + $0xa8] sm:$0xff] %v323_v5 }
  0x67   : > { %356 = vst [vmem:[%s1030_s29 + $0xb0] sm:$0xff] %v324_v8 }
  0x68   : > { %357 = vst [vmem:[%s1030_s29 + $0xb8] sm:$0xff] %v325_v11 }
  0x69   : > { %358 = vst [vmem:[%s1030_s29 + $0xc0] sm:$0xff] %v326_v14 }
  0x6a   : > { %359 = vst [vmem:[%s1030_s29 + $0xc8] sm:$0xff] %v327_v17 }
  0x6b   : > { %360 = vst [vmem:[%s1030_s29 + $0xd0] sm:$0xff] %v328_v20 }
  0x6c   : > { %361 = vst [vmem:[%s1030_s29 + $0xd8] sm:$0xff] %v329_v23 }
  0x6d   : > { %362 = vst [vmem:[%s1030_s29 + $0xe0] sm:$0xff] %v330_v26 }
  0x6e   : > { %363 = vst [vmem:[%s1030_s29 + $0xe8] sm:$0xff] %v331_v29 }
  0x6f   : > { %364 = vst [vmem:[%s1030_s29 + $0xf0] sm:$0xff] %v332_v30 }
  0x70   : > { %365 = vst [vmem:[%s1030_s29 + $0xf8] sm:$0xff] %v333_v31 }
  0x71   : > { %721 = shalt.err (!%p718_p9)
}
  0x72   : > { %s829_s22 = smov 128   ;;  %s830_s26 = smov 8  }
  0x73   : > { %526 = dma.vmem_to_hbm [thread:$0]  (%p968_p5), %s382_s30, 4096, %s384_s21, %s367_s27, %s829_s22, %s829_s22, %s830_s26  }
  0x74 PF: > { %s1199_s29 = sld [smem:[#allocation11_spill]]  ;;  %p532_p11 = scmp.ge.s32.totalorder %s822_s19, 2 }
  0x76   : > { %p529_p12 = pnand %p532_p11, %p975_p8 }
  0x78   : > { %p530_p0 = pneg %p529_p12 }
  0x7a   : > { %s398_s4 = sand.u32 1, %s1199_s29  }
  0x7b   : > { %s399_s15 = scalar_lea.sflag [#allocation4], %s398_s4 }
  0x7c   : > { %775 = dma.done.wait (%p530_p0), %s399_s15, 4096  }
  0x7d   : > { %777 = vsyncadd (%p530_p0), %s399_s15, 4294963200  ;;  %s21_s19 = sadd.s32 1, %s822_s19   ;;  %s1201_s16 = sld [smem:[#allocation14_spill]] }
  0x7e   : > { %p18_p4 = scmp.ge.s32.totalorder %s21_s19, 6   ;;  %s1202_s5 = sld [smem:[#allocation15_spill]] }
  0x7f   : > { %s1203_s8 = sld [smem:[#allocation12_spill]]  ;;  %s1205_s9 = smov %s786_s10 }
  0x80   : > { %s1204_s30 = sld [smem:[#allocation13_spill]]  ;;  %s1206_s10 = smov %s790_s11 }
  0x81   : > { %s1208_s12 = smov %s798_s13  ;;  %s1209_s13 = smov %s802_s14 }
  0x82   : > { %s1211_s15 = smov %s814_s17  ;;  %20 = sbr.rel (!%p18_p4) target bundleno = 11 (0xb), region = 86 }
  0x83   : > { %s1207_s11 = smov %s1201_s16  ;;  %s1212_s16 = smov %s818_s18 }
  0x84   : > { %s1210_s14 = smov %s1202_s5 }
  0x85   : > { %s1213_s17 = smov %s1203_s8 }
  0x86   : > { %s1214_s18 = smov %s1204_s30 }
  0x87   :  { %405 = vsyncpa [#allocation3], 1 }
  0x88   :  { %407 = vsyncpa [#allocation3 + $0x1], 1 }
  0x89   :  { %408 = vsyncpa [#allocation6], 1 }
  0x8a   :  { %410 = vsyncpa [#allocation6 + $0x1], 1 }
  0x8b   :  { %411 = vsyncpa [#allocation4], 1 }
  0x8c   :  { %413 = vsyncpa [#allocation4 + $0x1], 1 }

</bundles_post_ra>
